<compile_context>
chip_gen: v7x
topology: tpu7x:2x2x1
jax: 0.10.0
libtpu: 0.0.40
codegen_flags: <defaults>
</compile_context>

<pallas_src>
import functools

import jax
import jax.numpy as jnp
from jax.experimental import pallas as pl
from jax.experimental.pallas import tpu as pltpu


def _round_up(x, m):
    return -(-x // m) * m


def _fused_decoder_kernel(x_ref, p_ref, w1_ref, b1_ref, w2_ref, b2_ref, o_ref):
    K = p_ref.shape[1]
    KH = w1_ref.shape[1]
    H = KH // K
    TB = o_ref.shape[0]
    Dp = o_ref.shape[1]

    # Hidden layer for all K decoders at once (MXU): (TB, in_dim) @ (in_dim, K*H).
    x = x_ref[...].astype(w1_ref.dtype)
    h = jnp.dot(x, w1_ref[...], preferred_element_type=jnp.float32)
    h = jnp.maximum(h + b1_ref[...], 0.0)          # bias-add + ReLU in f32
    h = h.astype(w2_ref.dtype)                     # back to compute dtype for 2nd dot

    p = p_ref[...].astype(jnp.float32)             # (TB, K)
    out = jnp.zeros((TB, Dp), jnp.float32)
    # Per-decoder scaled partial dots; H is a multiple of 128 so the lane
    # slices of h / sublane slices of w2 are static and tile-aligned.
    for k in range(K):
        pk = p[:, k:k + 1]                          # (TB, 1)
        out = out + pk * jnp.dot(
            h[:, k * H:(k + 1) * H],
            w2_ref[k * H:(k + 1) * H, :],
            preferred_element_type=jnp.float32)
        out = out + pk * b2_ref[k:k + 1, :]         # VPU bias mix (no MXU drain)
    o_ref[...] = out.astype(o_ref.dtype)


def prepare_decoder_params(w1, b1, w2, b2, compute_dtype=jnp.bfloat16):
    """One-time parameter relayout (do this at parameter-prep time, NOT per call).

    w1: (K, in_dim, H), b1: (K, H), w2: (K, H, D), b2: (K, D)
    Returns lane-dense concatenated matrices, output dim padded to a multiple
    of 128, weights cast to `compute_dtype` (biases stay f32)."""
    K, in_dim, H = w1.shape
    D = w2.shape[-1]
    Dp = _round_up(max(D, 128), 128)

    w1c = jnp.transpose(w1, (1, 0, 2)).reshape(in_dim, K * H).astype(compute_dtype)
    b1c = b1.reshape(1, K * H).astype(jnp.float32)
    w2c = jnp.pad(w2.reshape(K * H, D), ((0, 0), (0, Dp - D))).astype(compute_dtype)
    b2c = jnp.pad(b2, ((0, 0), (0, Dp - D))).astype(jnp.float32)
    return dict(w1c=w1c, b1c=b1c, w2c=w2c, b2c=b2c,
                K=K, H=H, D=D, Dp=Dp, in_dim=in_dim)


def channel_decoder_selector(rx, mod_probs, params, *, tb=256):
    """rx: (B, in_dim), mod_probs: (B, K), params from prepare_decoder_params."""
    B, in_dim = rx.shape
    K, H, D, Dp = params["K"], params["H"], params["D"], params["Dp"]
    KH = K * H

    # Batch tiling: TB rows per grid step (>= one MXU/sublane tile).  Small B
    # is padded up to one tile; large B is split over a pipelined grid.
    if B < tb:
        pad_B = max(8, _round_up(B, 8))
        TB = pad_B
    else:
        TB = tb
        pad_B = _round_up(B, TB)
    if pad_B != B:
        rx = jnp.pad(rx, ((0, pad_B - B), (0, 0)))
        mod_probs = jnp.pad(mod_probs, ((0, pad_B - B), (0, 0)))
    grid = (pad_B // TB,)

    # VMEM budget: resident weights + double-buffered x/p/out tiles + h/out
    # intermediates.  Clamp to 48 MiB so a big config still fits v7x (64 MiB
    # physical); floor at 16 MiB so v5e's small default never truncates.
    wb = params["w1c"].dtype.itemsize
    xb = rx.dtype.itemsize
    est = ((in_dim * KH + KH * Dp) * wb + (KH + K * Dp) * 4
           + 2 * TB * (in_dim * xb + K * mod_probs.dtype.itemsize + Dp * xb)
           + TB * (KH + Dp) * 4)
    vmem_limit = int(min(max(2 * est + (1 << 20), 16 << 20), 48 << 20))

    out = pl.pallas_call(
        _fused_decoder_kernel,
        out_shape=jax.ShapeDtypeStruct((pad_B, Dp), rx.dtype),
        grid=grid,
        in_specs=[
            pl.BlockSpec((TB, in_dim), lambda i: (i, 0)),   # rx tile
            pl.BlockSpec((TB, K), lambda i: (i, 0)),        # mod_probs tile
            pl.BlockSpec((in_dim, KH), lambda i: (0, 0)),   # w1c (resident)
            pl.BlockSpec((1, KH), lambda i: (0, 0)),        # b1c (resident)
            pl.BlockSpec((KH, Dp), lambda i: (0, 0)),       # w2c (resident)
            pl.BlockSpec((K, Dp), lambda i: (0, 0)),        # b2c (resident)
        ],
        out_specs=pl.BlockSpec((TB, Dp), lambda i: (i, 0)),
        compiler_params=pltpu.CompilerParams(
            dimension_semantics=("parallel",),
            vmem_limit_bytes=vmem_limit),
    )(rx, mod_probs, params["w1c"], params["b1c"], params["w2c"], params["b2c"])
    return out[:B, :D]


def simple_channel_decoder(rx, w1, b1, w2, b2, compute_dtype=jnp.float32):
    """Plain SimpleChannelDecoder.forward: relu(rx @ w1 + b1) @ w2 + b2.
       w1: (in_dim, H), b1: (H,), w2: (H, D), b2: (D,)."""
    params = prepare_decoder_params(w1[None], b1[None], w2[None], b2[None],
                                    compute_dtype=compute_dtype)
    ones = jnp.ones((rx.shape[0], 1), rx.dtype)
    return channel_decoder_selector(rx, ones, params)


def _reference(rx, mod_probs, w1, b1, w2, b2):
    # Pure-JAX f32 reference mirroring the PyTorch forward.
    h = jnp.maximum(jnp.einsum("bi,kih->kbh", rx, w1) + b1[:, None, :], 0.0)
    y = jnp.einsum("kbh,khd->kbd", h, w2) + b2[:, None, :]           # (K, B, D)
    dec_stack = jnp.transpose(y, (1, 2, 0))                          # (B, D, K)
    return (dec_stack * mod_probs[:, None, :]).sum(-1)               # (B, D)


if __name__ == "__main__":
    # Small, module-consistent shapes.
    B, input_dim, d_model, K, H = 2, 32, 32, 4, 256

    key = jax.random.PRNGKey(0)
    k_rx, k_p, k_w1, k_b1, k_w2, k_b2 = jax.random.split(key, 6)

    rx = jax.random.normal(k_rx, (B, input_dim), dtype=jnp.float32)
    mod_probs = jax.nn.softmax(
        jax.random.normal(k_p, (B, K), dtype=jnp.float32), axis=-1)

    # Deterministic synthetic parameters (PyTorch Linear-ish scaling).
    w1 = jax.random.normal(k_w1, (K, input_dim, H), jnp.float32) * (1.0 / input_dim ** 0.5)
    b1 = jax.random.normal(k_b1, (K, H), jnp.float32) * 0.01
    w2 = jax.random.normal(k_w2, (K, H, d_model), jnp.float32) * (1.0 / H ** 0.5)
    b2 = jax.random.normal(k_b2, (K, d_model), jnp.float32) * 0.01

    ref = _reference(rx, mod_probs, w1, b1, w2, b2)

    # 1) f32 compute path: exact semantics, tight tolerance.
    params_f32 = prepare_decoder_params(w1, b1, w2, b2, compute_dtype=jnp.float32)
    out_f32 = jax.block_until_ready(channel_decoder_selector(rx, mod_probs, params_f32))
    assert out_f32.shape == (B, d_model)
    assert jnp.allclose(out_f32, ref, atol=1e-4, rtol=1e-3), "f32 selector mismatch"

    # 2) bf16-weight perf path (default prepare_decoder_params config), loose tolerance.
    params_bf16 = prepare_decoder_params(w1, b1, w2, b2, compute_dtype=jnp.bfloat16)
    out_bf16 = jax.block_until_ready(channel_decoder_selector(rx, mod_probs, params_bf16))
    assert out_bf16.shape == (B, d_model)
    assert jnp.allclose(out_bf16, ref, atol=5e-2, rtol=5e-2), "bf16 selector mismatch"

    # 3) Plain SimpleChannelDecoder forward (decoder 0) via the same fused kernel.
    out_single = jax.block_until_ready(
        simple_channel_decoder(rx, w1[0], b1[0], w2[0], b2[0]))
    ref_single = jnp.maximum(rx @ w1[0] + b1[0], 0.0) @ w2[0] + b2[0]
    assert out_single.shape == (B, d_model)
    assert jnp.allclose(out_single, ref_single, atol=1e-4, rtol=1e-3), \
        "single-decoder mismatch vs reference"

    print("KERNEL_OK")
</pallas_src>

<mosaic_0001>
module attributes {stable_mosaic.version = 11 : i64} {
  func.func @_fused_decoder_kernel(%arg0: i32, %arg1: memref<8x32xf32, #tpu.memory_space<vmem>>, %arg2: memref<8x4xf32, #tpu.memory_space<vmem>>, %arg3: memref<32x1024xf32, #tpu.memory_space<vmem>>, %arg4: memref<1x1024xf32, #tpu.memory_space<vmem>>, %arg5: memref<1024x128xf32, #tpu.memory_space<vmem>>, %arg6: memref<4x128xf32, #tpu.memory_space<vmem>>, %arg7: memref<8x128xf32, #tpu.memory_space<vmem>>) attributes {dimension_semantics = [#tpu.dimension_semantics<parallel>], iteration_bounds = array<i64: 1>, scalar_prefetch = 0 : i64, scratch_operands = 0 : i64, tpu.core_type = #tpu.core_type<tc>, window_params = [{transform_indices = @transform_0, window_bounds = array<i64: 8, 32>}, {transform_indices = @transform_1, window_bounds = array<i64: 8, 4>}, {pipeline_mode = #tpu.pipeline_mode<synchronous>, transform_indices = @transform_2, window_bounds = array<i64: 32, 1024>}, {pipeline_mode = #tpu.pipeline_mode<synchronous>, transform_indices = @transform_3, window_bounds = array<i64: 1, 1024>}, {pipeline_mode = #tpu.pipeline_mode<synchronous>, transform_indices = @transform_4, window_bounds = array<i64: 1024, 128>}, {pipeline_mode = #tpu.pipeline_mode<synchronous>, transform_indices = @transform_5, window_bounds = array<i64: 4, 128>}, {transform_indices = @transform_6, window_bounds = array<i64: 8, 128>}]} {
    %c0 = arith.constant 0 : index
    %c0_0 = arith.constant 0 : index
    %0 = vector.load %arg1[%c0, %c0_0] : memref<8x32xf32, #tpu.memory_space<vmem>>, vector<8x32xf32>
    %c0_1 = arith.constant 0 : index
    %c0_2 = arith.constant 0 : index
    %1 = vector.load %arg3[%c0_1, %c0_2] : memref<32x1024xf32, #tpu.memory_space<vmem>>, vector<32x1024xf32>
    %cst = arith.constant dense<0.000000e+00> : vector<8x1024xf32>
    %2 = tpu.matmul %0, %1, %cst {dimension_numbers = #tpu.dot_dimension_numbers<[1], [0], [0], [1], [0, 0, 1, 1], [], []>} : vector<8x32xf32>, vector<32x1024xf32>, vector<8x1024xf32> -> vector<8x1024xf32>
    %c0_3 = arith.constant 0 : index
    %c0_4 = arith.constant 0 : index
    %3 = vector.load %arg4[%c0_3, %c0_4] : memref<1x1024xf32, #tpu.memory_space<vmem>>, vector<1x1024xf32>
    %4 = vector.broadcast %3 : vector<1x1024xf32> to vector<8x1024xf32>
    %5 = arith.addf %2, %4 : vector<8x1024xf32>
    %cst_5 = arith.constant 0.000000e+00 : f32
    %6 = vector.broadcast %cst_5 : f32 to vector<8x1024xf32>
    %7 = arith.maximumf %5, %6 : vector<8x1024xf32>
    %c0_6 = arith.constant 0 : index
    %c0_7 = arith.constant 0 : index
    %8 = vector.load %arg2[%c0_6, %c0_7] : memref<8x4xf32, #tpu.memory_space<vmem>>, vector<8x4xf32>
    %cst_8 = arith.constant 0.000000e+00 : f32
    %9 = vector.broadcast %cst_8 : f32 to vector<8x128xf32>
    %10 = vector.extract_strided_slice %8 {offsets = [0, 0], sizes = [8, 1], strides = [1, 1]} : vector<8x4xf32> to vector<8x1xf32>
    %11 = vector.extract_strided_slice %7 {offsets = [0, 0], sizes = [8, 256], strides = [1, 1]} : vector<8x1024xf32> to vector<8x256xf32>
    %c0_9 = arith.constant 0 : index
    %c0_10 = arith.constant 0 : index
    %12 = vector.load %arg5[%c0_9, %c0_10] : memref<1024x128xf32, #tpu.memory_space<vmem>>, vector<256x128xf32>
    %cst_11 = arith.constant dense<0.000000e+00> : vector<8x128xf32>
    %13 = tpu.matmul %11, %12, %cst_11 {dimension_numbers = #tpu.dot_dimension_numbers<[1], [0], [0], [1], [0, 0, 1, 1], [], []>} : vector<8x256xf32>, vector<256x128xf32>, vector<8x128xf32> -> vector<8x128xf32>
    %14 = vector.broadcast %10 : vector<8x1xf32> to vector<8x128xf32>
    %15 = arith.mulf %14, %13 : vector<8x128xf32>
    %16 = arith.addf %9, %15 : vector<8x128xf32>
    %c0_12 = arith.constant 0 : index
    %c0_13 = arith.constant 0 : index
    %17 = vector.load %arg6[%c0_12, %c0_13] : memref<4x128xf32, #tpu.memory_space<vmem>>, vector<1x128xf32>
    %18 = vector.broadcast %10 : vector<8x1xf32> to vector<8x128xf32>
    %19 = vector.broadcast %17 : vector<1x128xf32> to vector<8x128xf32>
    %20 = arith.mulf %18, %19 : vector<8x128xf32>
    %21 = arith.addf %16, %20 : vector<8x128xf32>
    %22 = vector.extract_strided_slice %8 {offsets = [0, 1], sizes = [8, 1], strides = [1, 1]} : vector<8x4xf32> to vector<8x1xf32>
    %23 = vector.extract_strided_slice %7 {offsets = [0, 256], sizes = [8, 256], strides = [1, 1]} : vector<8x1024xf32> to vector<8x256xf32>
    %c256 = arith.constant 256 : index
    %c0_14 = arith.constant 0 : index
    %24 = vector.load %arg5[%c256, %c0_14] : memref<1024x128xf32, #tpu.memory_space<vmem>>, vector<256x128xf32>
    %cst_15 = arith.constant dense<0.000000e+00> : vector<8x128xf32>
    %25 = tpu.matmul %23, %24, %cst_15 {dimension_numbers = #tpu.dot_dimension_numbers<[1], [0], [0], [1], [0, 0, 1, 1], [], []>} : vector<8x256xf32>, vector<256x128xf32>, vector<8x128xf32> -> vector<8x128xf32>
    %26 = vector.broadcast %22 : vector<8x1xf32> to vector<8x128xf32>
    %27 = arith.mulf %26, %25 : vector<8x128xf32>
    %28 = arith.addf %21, %27 : vector<8x128xf32>
    %c1 = arith.constant 1 : index
    %c0_16 = arith.constant 0 : index
    %29 = vector.load %arg6[%c1, %c0_16] : memref<4x128xf32, #tpu.memory_space<vmem>>, vector<1x128xf32>
    %30 = vector.broadcast %22 : vector<8x1xf32> to vector<8x128xf32>
    %31 = vector.broadcast %29 : vector<1x128xf32> to vector<8x128xf32>
    %32 = arith.mulf %30, %31 : vector<8x128xf32>
    %33 = arith.addf %28, %32 : vector<8x128xf32>
    %34 = vector.extract_strided_slice %8 {offsets = [0, 2], sizes = [8, 1], strides = [1, 1]} : vector<8x4xf32> to vector<8x1xf32>
    %35 = vector.extract_strided_slice %7 {offsets = [0, 512], sizes = [8, 256], strides = [1, 1]} : vector<8x1024xf32> to vector<8x256xf32>
    %c512 = arith.constant 512 : index
    %c0_17 = arith.constant 0 : index
    %36 = vector.load %arg5[%c512, %c0_17] : memref<1024x128xf32, #tpu.memory_space<vmem>>, vector<256x128xf32>
    %cst_18 = arith.constant dense<0.000000e+00> : vector<8x128xf32>
    %37 = tpu.matmul %35, %36, %cst_18 {dimension_numbers = #tpu.dot_dimension_numbers<[1], [0], [0], [1], [0, 0, 1, 1], [], []>} : vector<8x256xf32>, vector<256x128xf32>, vector<8x128xf32> -> vector<8x128xf32>
    %38 = vector.broadcast %34 : vector<8x1xf32> to vector<8x128xf32>
    %39 = arith.mulf %38, %37 : vector<8x128xf32>
    %40 = arith.addf %33, %39 : vector<8x128xf32>
    %c2 = arith.constant 2 : index
    %c0_19 = arith.constant 0 : index
    %41 = vector.load %arg6[%c2, %c0_19] : memref<4x128xf32, #tpu.memory_space<vmem>>, vector<1x128xf32>
    %42 = vector.broadcast %34 : vector<8x1xf32> to vector<8x128xf32>
    %43 = vector.broadcast %41 : vector<1x128xf32> to vector<8x128xf32>
    %44 = arith.mulf %42, %43 : vector<8x128xf32>
    %45 = arith.addf %40, %44 : vector<8x128xf32>
    %46 = vector.extract_strided_slice %8 {offsets = [0, 3], sizes = [8, 1], strides = [1, 1]} : vector<8x4xf32> to vector<8x1xf32>
    %47 = vector.extract_strided_slice %7 {offsets = [0, 768], sizes = [8, 256], strides = [1, 1]} : vector<8x1024xf32> to vector<8x256xf32>
    %c768 = arith.constant 768 : index
    %c0_20 = arith.constant 0 : index
    %48 = vector.load %arg5[%c768, %c0_20] : memref<1024x128xf32, #tpu.memory_space<vmem>>, vector<256x128xf32>
    %cst_21 = arith.constant dense<0.000000e+00> : vector<8x128xf32>
    %49 = tpu.matmul %47, %48, %cst_21 {dimension_numbers = #tpu.dot_dimension_numbers<[1], [0], [0], [1], [0, 0, 1, 1], [], []>} : vector<8x256xf32>, vector<256x128xf32>, vector<8x128xf32> -> vector<8x128xf32>
    %50 = vector.broadcast %46 : vector<8x1xf32> to vector<8x128xf32>
    %51 = arith.mulf %50, %49 : vector<8x128xf32>
    %52 = arith.addf %45, %51 : vector<8x128xf32>
    %c3 = arith.constant 3 : index
    %c0_22 = arith.constant 0 : index
    %53 = vector.load %arg6[%c3, %c0_22] : memref<4x128xf32, #tpu.memory_space<vmem>>, vector<1x128xf32>
    %54 = vector.broadcast %46 : vector<8x1xf32> to vector<8x128xf32>
    %55 = vector.broadcast %53 : vector<1x128xf32> to vector<8x128xf32>
    %56 = arith.mulf %54, %55 : vector<8x128xf32>
    %57 = arith.addf %52, %56 : vector<8x128xf32>
    %c0_23 = arith.constant 0 : index
    %c0_24 = arith.constant 0 : index
    %58 = vector.load %arg7[%c0_23, %c0_24] : memref<8x128xf32, #tpu.memory_space<vmem>>, vector<8x128xf32>
    tpu.vector_store %arg7[%c0_23, %c0_24], %57 {strides = array<i32>} : memref<8x128xf32, #tpu.memory_space<vmem>>, vector<8x128xf32>,
    return
  }
  func.func @transform_0(%arg0: i32) -> (i32, i32) {
    %c0_i32 = arith.constant 0 : i32
    %c0_i32_0 = arith.constant 0 : i32
    return %arg0, %c0_i32 : i32, i32
  }
  func.func @transform_1(%arg0: i32) -> (i32, i32) {
    %c0_i32 = arith.constant 0 : i32
    %c0_i32_0 = arith.constant 0 : i32
    return %arg0, %c0_i32 : i32, i32
  }
  func.func @transform_2(%arg0: i32) -> (i32, i32) {
    %c0_i32 = arith.constant 0 : i32
    %c0_i32_0 = arith.constant 0 : i32
    %c0_i32_1 = arith.constant 0 : i32
    return %c0_i32, %c0_i32_0 : i32, i32
  }
  func.func @transform_3(%arg0: i32) -> (i32, i32) {
    %c0_i32 = arith.constant 0 : i32
    %c0_i32_0 = arith.constant 0 : i32
    %c0_i32_1 = arith.constant 0 : i32
    return %c0_i32, %c0_i32_0 : i32, i32
  }
  func.func @transform_4(%arg0: i32) -> (i32, i32) {
    %c0_i32 = arith.constant 0 : i32
    %c0_i32_0 = arith.constant 0 : i32
    %c0_i32_1 = arith.constant 0 : i32
    return %c0_i32, %c0_i32_0 : i32, i32
  }
  func.func @transform_5(%arg0: i32) -> (i32, i32) {
    %c0_i32 = arith.constant 0 : i32
    %c0_i32_0 = arith.constant 0 : i32
    %c0_i32_1 = arith.constant 0 : i32
    return %c0_i32, %c0_i32_0 : i32, i32
  }
  func.func @transform_6(%arg0: i32) -> (i32, i32) {
    %c0_i32 = arith.constant 0 : i32
    %c0_i32_0 = arith.constant 0 : i32
    return %arg0, %c0_i32 : i32, i32
  }
}

</mosaic_0001>

<bundles_post_ra>
// kernel: tpu_custom_call.1
= control target key start
LH: loop header
LB: loop body
LE: loop exit
PB: predicated region body
PF: predicated region fallthrough
CT: control target
= control target key end

     0   :  { %11 = vsyncpa [#allocation3], 0  ;;  %s1443_s0 = inlined_call_operand.vmem [shape: f32[8,32], index: 0, kind: input, shape index: {}]   ;;  %s1444_s1 = inlined_call_operand.vmem [shape: f32[8,4], index: 1, kind: input, shape index: {}]   ;;  %s1445_s2 = inlined_call_operand.hbm [shape: f32[32,1024], index: 2, kind: input, shape index: {}]   ;;  %s1446_s3 = inlined_call_operand.vmem [shape: f32[1,1024], index: 3, kind: input, shape index: {}]   ;;  %s1447_s4 = inlined_call_operand.hbm [shape: f32[1024,128], index: 4, kind: input, shape index: {}]   ;;  %s1448_s5 = inlined_call_operand.vmem [shape: f32[4,128], index: 5, kind: input, shape index: {}]   ;;  %s1449_s6 = inlined_call_operand.hbm [shape: f32[8,128], index: 6, kind: output, shape index: {}]  }
   0x1   :  { %12 = vsyncpa [#allocation6], 0 }
   0x2   :  { %13 = vsyncpa [#allocation4], 0  ;;  %s1299_s21 = smov [#allocation2]   ;;  %s1227_s25 = scalar_lea.hbm %s1445_s2, 4096 }
   0x3   :  { %s23_s22 = sshll.u32 %s1299_s21, 4  ;;  %p1228_p0 = scmp.ne.s32.totalorder %s1445_s2, %s1227_s25  ;;  %s24_s22 = int_to_ptr.vmem [resolvable:$true] %s23_s22 }
   0x4   :  { %p1231_p1 = scmp.lt.u32.totalorder %s1227_s25, %s1445_s2 }
   0x6   :  { %p1233_p2 = pnand %p1231_p1, %p1228_p0 }
   0x8   :  { %1236 = shalt.err (!%p1233_p2)
}
   0x9   :  { %s1237_s30 = scalar_lea.vmem %s24_s22, 4096  ;;  %p1242_p4 = scmp.lt.s32.totalorder %s24_s22, %s24_s22 }
   0xa   :  { %p1238_p3 = scmp.ne.s32.totalorder %s24_s22, %s1237_s30  ;;  %p1243_p5 = scmp.lt.s32.totalorder %s1237_s30, %s1237_s30 }
   0xc   :  { %p1244_p6 = por %p1243_p5, %p1242_p4 }
   0xe   :  { %p1245_p7 = pnand %p1244_p6, %p1238_p3 }
  0x10   :  { %1248 = shalt.err (!%p1245_p7)
}
  0x11   :  { %s1300_s7 = smov 1024   ;;  %s1301_s8 = smov 64  }
  0x12   :  { %29 = dma.hbm_to_vmem [thread:$0]  %s1445_s2, 4096, %s24_s22, [#allocation3], %s1300_s7, %s1300_s7, %s1301_s8  }
  0x13   :  { %s1302_s11 = smov [#allocation5]   ;;  %s1249_s15 = scalar_lea.hbm %s1447_s4, 16384 }
  0x14   :  { %s37_s12 = sshll.u32 %s1302_s11, 4  ;;  %p1250_p8 = scmp.ne.s32.totalorder %s1447_s4, %s1249_s15  ;;  %s38_s12 = int_to_ptr.vmem [resolvable:$true] %s37_s12 }
  0x15   :  { %p1253_p9 = scmp.lt.u32.totalorder %s1249_s15, %s1447_s4 }
  0x17   :  { %p1255_p10 = pnand %p1253_p9, %p1250_p8 }
  0x19   :  { %1258 = shalt.err (!%p1255_p10)
}
  0x1a   :  { %s1259_s20 = scalar_lea.vmem %s38_s12, 16384  ;;  %p1264_p12 = scmp.lt.s32.totalorder %s38_s12, %s38_s12 }
  0x1b   :  { %p1260_p11 = scmp.ne.s32.totalorder %s38_s12, %s1259_s20  ;;  %p1265_p13 = scmp.lt.s32.totalorder %s1259_s20, %s1259_s20 }
  0x1d   :  { %p1266_p0 = por %p1265_p13, %p1264_p12 }
  0x1f   :  { %p1267_p1 = pnand %p1266_p0, %p1260_p11 }
  0x21   :  { %1270 = shalt.err (!%p1267_p1)
}
  0x22   :  { %s1303_s2 = smov 128   ;;  %s1304_s21 = smov 8  }
  0x23   :  { %43 = dma.hbm_to_vmem [thread:$0]  %s1447_s4, 16384, %s38_s12, [#allocation6], %s1303_s2, %s1303_s2, %s1304_s21  }
  0x24   :  { %1293 = dma.done.wait [#allocation3], 4096  }
  0x25   :  { %1294 = vsyncadd [#allocation3], 4294963200 }
  0x26   :  { %1295 = dma.done.wait [#allocation6], 16384  }
  0x27   :  { %1296 = vsyncadd [#allocation6], 4294950912  ;;  %v1305_v0 = vmov 0.0   ;;  %v54_v1 = vld [vmem:[#allocation2 + $0x8] sm:$0xff]  ;;  %v53_v3 = vld [vmem:[#allocation2] sm:$0xff]  ;;  %vm127_vm0 = vcmask 261120  }
  0x28   :  { %195 = vmatprep.mubr.f32.mxu0 %v1305_v0  ;;  %266 = vmatprep.mubr.f32.mxu1 %v1305_v0  ;;  %v62_v2 = vld [vmem:[#allocation2 + $0x48] sm:$0xff]  ;;  %v61_v5 = vld [vmem:[#allocation2 + $0x40] sm:$0xff]  ;;  %v56_v6 = vld [vmem:[#allocation2 + $0x18] sm:$0xff]  ;;  %s1310_s10 = smov [#allocation7]  }
  0x29   :  { %v1050_v4 = vpack.c.bf16 %v62_v2, %v54_v1  ;;  %v64_v7 = vld [vmem:[#allocation2 + $0x58] sm:$0xff]  ;;  %v1052_v8 = vpack.c.bf16 %v61_v5, %v53_v3  ;;  %v55_v10 = vld [vmem:[#allocation2 + $0x10] sm:$0xff]  ;;  %v70_v12 = vld [vmem:[#allocation2 + $0x88] sm:$0xff]  ;;  %s892_s11 = sshll.u32 %s1310_s10, 4  ;;  %s893_s11 = int_to_ptr.vmem [resolvable:$true] %s892_s11 }
  0x2a   :  { %v1058_v9 = vpack.c.bf16 %v64_v7, %v56_v6  ;;  %v63_v11 = vld [vmem:[#allocation2 + $0x50] sm:$0xff]  ;;  %v78_v14 = vld [vmem:[#allocation2 + $0xc8] sm:$0xff]  ;;  %v69_v15 = vld [vmem:[#allocation2 + $0x80] sm:$0xff]  ;;  %s1271_s12 = scalar_lea.vmem %s893_s11, 128  ;;  %p1276_p3 = scmp.lt.s32.totalorder %s893_s11, %s893_s11 }
  0x2b   :  { %1051 = vmatprep.subr.bf16.mxu0 %v1050_v4  ;;  %v1060_v13 = vpack.c.bf16 %v63_v11, %v55_v10  ;;  %v77_v16 = vld [vmem:[#allocation2 + $0xc0] sm:$0xff]  ;;  %v1054_v17 = vpack.c.bf16 %v78_v14, %v70_v12  ;;  %v72_v19 = vld [vmem:[#allocation2 + $0x98] sm:$0xff]  ;;  %v71_v21 = vld [vmem:[#allocation2 + $0x90] sm:$0xff]  ;;  %p1272_p2 = scmp.ne.s32.totalorder %s893_s11, %s1271_s12  ;;  %p1277_p4 = scmp.lt.s32.totalorder %s1271_s12, %s1271_s12 }
  0x2c   :  { %1053 = vmatpush1.bf16.msra.mxu0 %v1052_v8  ;;  %1059 = vmatprep.subr.bf16.mxu1 %v1058_v9  ;;  %v1056_v18 = vpack.c.bf16 %v77_v16, %v69_v15  ;;  %v80_v20 = vld [vmem:[#allocation2 + $0xd8] sm:$0xff]  ;;  %v79_v23 = vld [vmem:[#allocation2 + $0xd0] sm:$0xff]  ;;  %v58_v24 = vld [vmem:[#allocation2 + $0x28] sm:$0xff] }
  0x2d   :  { %1061 = vmatpush1.bf16.msra.mxu1 %v1060_v13  ;;  %v1062_v22 = vpack.c.bf16 %v80_v20, %v72_v19  ;;  %1055 = vmatprep.subr.bf16.mxu0 %v1054_v17  ;;  %v1064_v25 = vpack.c.bf16 %v79_v23, %v71_v21  ;;  %v1375_v26 = vld [vmem:[%s1443_s0] sm:$0xff]  ;;  %v66_v27 = vld [vmem:[#allocation2 + $0x68] sm:$0xff]  ;;  %v60_v31 = vld [vmem:[#allocation2 + $0x38] sm:$0xff]  ;;  %p1278_p5 = por %p1277_p4, %p1276_p3 }
  0x2e   :  { %v57_v28 = vld [vmem:[#allocation2 + $0x20] sm:$0xff]  ;;  %v1066_v30 = vpack.c.bf16 %v66_v27, %v58_v24  ;;  %v68_v32 = vld [vmem:[#allocation2 + $0x78] sm:$0xff]  ;;  %v59_v33 = vld [vmem:[#allocation2 + $0x30] sm:$0xff] }
  0x2f   :  { %v65_v29 = vld [vmem:[#allocation2 + $0x60] sm:$0xff]  ;;  %1063 = vmatprep.subr.bf16.mxu1 %v1062_v22  ;;  %v1074_v35 = vpack.c.bf16 %v68_v32, %v60_v31  ;;  %v67_v36 = vld [vmem:[#allocation2 + $0x70] sm:$0xff]  ;;  %v74_v37 = vld [vmem:[#allocation2 + $0xa8] sm:$0xff]  ;;  %p1279_p6 = pnand %p1278_p5, %p1272_p2 }
  0x30   :  { %1057 = vmatpush1.bf16.msra.mxu0 %v1056_v18  ;;  %v1068_v34 = vpack.c.bf16 %v65_v29, %v57_v28  ;;  %v82_v38 = vld [vmem:[#allocation2 + $0xe8] sm:$0xff]  ;;  %v1076_v39 = vpack.c.bf16 %v67_v36, %v59_v33  ;;  %v73_v41 = vld [vmem:[#allocation2 + $0xa0] sm:$0xff]  ;;  %v76_v43 = vld [vmem:[#allocation2 + $0xb8] sm:$0xff] }
  0x31   :  { %1065 = vmatpush1.bf16.msra.mxu1 %v1064_v25  ;;  %1067 = vmatprep.subr.bf16.mxu0 %v1066_v30  ;;  %v1070_v40 = vpack.c.bf16 %v82_v38, %v74_v37  ;;  %v81_v42 = vld [vmem:[#allocation2 + $0xe0] sm:$0xff]  ;;  %v84_v44 = vld [vmem:[#allocation2 + $0xf8] sm:$0xff]  ;;  %v75_v45 = vld [vmem:[#allocation2 + $0xb0] sm:$0xff] }
  0x32   :  { %1075 = vmatprep.subr.bf16.mxu1 %v1074_v35  ;;  %v83_v46 = vld [vmem:[#allocation2 + $0xf0] sm:$0xff]  ;;  %v1078_v47 = vpack.c.bf16 %v84_v44, %v76_v43  ;;  %v440_v48 = vld [vmem:[#allocation5 + $0x80] sm:$0xff]  ;;  %v441_v49 = vld [vmem:[#allocation5 + $0x88] sm:$0xff]  ;;  %v1072_v50 = vpack.c.bf16 %v81_v42, %v73_v41 }
  0x33   :  { %902 = vmatmul.mubr.msk.f32.vlgmr.msra.gmra.mrb[0].mxu0 %vm127_vm0, %v1375_v26  ;;  %v556_v51 = vld [vmem:[#allocation5 + $0x180] sm:$0xff]  ;;  %v557_v52 = vld [vmem:[#allocation5 + $0x188] sm:$0xff]  ;;  %v1080_v53 = vpack.c.bf16 %v83_v46, %v75_v45  ;;  %v1082_v54 = vpack.c.bf16 %v441_v49, %v440_v48  ;;  %v442_v60 = vld [vmem:[#allocation5 + $0x90] sm:$0xff] }
  0x34   :  { %903 = vmatmul.mubr.msk.f32.vlgmr.msra.gmra.mrb[0].mxu1 %vm127_vm0, %v1375_v26  ;;  %1069 = vmatpush1.bf16.msra.mxu0 %v1068_v34  ;;  %v424_v55 = vld [vmem:[#allocation5] sm:$0xff]  ;;  %v425_v56 = vld [vmem:[#allocation5 + $0x8] sm:$0xff]  ;;  %v1114_v58 = vpack.c.bf16 %v557_v52, %v556_v51  ;;  %v443_v61 = vld [vmem:[#allocation5 + $0x98] sm:$0xff] }
  0x35   :  { %1077 = vmatpush1.bf16.msra.mxu1 %v1076_v39  ;;  %1071 = vmatprep.subr.bf16.mxu0 %v1070_v40  ;;  %v540_v57 = vld [vmem:[#allocation5 + $0x100] sm:$0xff]  ;;  %v541_v59 = vld [vmem:[#allocation5 + $0x108] sm:$0xff]  ;;  %v558_v62 = vld [vmem:[#allocation5 + $0x190] sm:$0xff]  ;;  %v1084_v1 = vpack.c.bf16 %v425_v56, %v424_v55  ;;  %v1086_v3 = vpack.c.bf16 %v443_v61, %v442_v60 }
  0x36   :  { %1079 = vmatprep.subr.bf16.mxu1 %v1078_v47  ;;  %337 = vmatprep.mubr.f32.mxu0 %v1305_v0  ;;  %v559_v63 = vld [vmem:[#allocation5 + $0x198] sm:$0xff]  ;;  %v1116_v2 = vpack.c.bf16 %v541_v59, %v540_v57  ;;  %v426_v4 = vld [vmem:[#allocation5 + $0x10] sm:$0xff]  ;;  %v444_v9 = vld [vmem:[#allocation5 + $0xa0] sm:$0xff] }
  0x37   :  { %408 = vmatprep.mubr.f32.mxu1 %v1305_v0  ;;  %v427_v5 = vld [vmem:[#allocation5 + $0x18] sm:$0xff]  ;;  %v542_v6 = vld [vmem:[#allocation5 + $0x110] sm:$0xff]  ;;  %v1118_v7 = vpack.c.bf16 %v559_v63, %v558_v62  ;;  %v445_v10 = vld [vmem:[#allocation5 + $0xa8] sm:$0xff] }
  0x38   :  { %1073 = vmatpush1.bf16.msra.mxu0 %v1072_v50  ;;  %v543_v8 = vld [vmem:[#allocation5 + $0x118] sm:$0xff]  ;;  %v560_v0 = vld [vmem:[#allocation5 + $0x1a0] sm:$0xff]  ;;  %v561_v11 = vld [vmem:[#allocation5 + $0x1a8] sm:$0xff]  ;;  %v1088_v12 = vpack.c.bf16 %v427_v5, %v426_v4  ;;  %v1090_v14 = vpack.c.bf16 %v445_v10, %v444_v9 }
  0x39   :  { %1081 = vmatpush1.bf16.msra.mxu1 %v1080_v53  ;;  %1083 = vmatprep.subr.bf16.mxu0 %v1082_v54  ;;  %v1120_v13 = vpack.c.bf16 %v543_v8, %v542_v6  ;;  %v428_v15 = vld [vmem:[#allocation5 + $0x20] sm:$0xff]  ;;  %v429_v16 = vld [vmem:[#allocation5 + $0x28] sm:$0xff]  ;;  %v1122_v18 = vpack.c.bf16 %v561_v11, %v560_v0  ;;  %v446_v20 = vld [vmem:[#allocation5 + $0xb0] sm:$0xff] }
  0x3a   :  { %1115 = vmatprep.subr.bf16.mxu1 %v1114_v58  ;;  %v544_v17 = vld [vmem:[#allocation5 + $0x120] sm:$0xff]  ;;  %v545_v19 = vld [vmem:[#allocation5 + $0x128] sm:$0xff]  ;;  %v447_v21 = vld [vmem:[#allocation5 + $0xb8] sm:$0xff]  ;;  %v1092_v24 = vpack.c.bf16 %v429_v16, %v428_v15 }
  0x3b   :  { %904 = vmatmul.mubr.msk.f32.vlgmr.msra.gmra.mrb[2].mxu0 %vm127_vm0, %v1375_v26  ;;  %v562_v22 = vld [vmem:[#allocation5 + $0x1b0] sm:$0xff]  ;;  %v563_v23 = vld [vmem:[#allocation5 + $0x1b8] sm:$0xff]  ;;  %v1124_v25 = vpack.c.bf16 %v545_v19, %v544_v17  ;;  %v448_v32 = vld [vmem:[#allocation5 + $0xc0] sm:$0xff] }
  0x3c   :  { %905 = vmatmul.mubr.msk.f32.vlgmr.msra.gmra.mrb[2].mxu1 %vm127_vm0, %v1375_v26  ;;  %1085 = vmatpush3.bf16.msra.mxu0 %v1084_v1  ;;  %v1094_v26 = vpack.c.bf16 %v447_v21, %v446_v20  ;;  %v430_v27 = vld [vmem:[#allocation5 + $0x30] sm:$0xff]  ;;  %v431_v28 = vld [vmem:[#allocation5 + $0x38] sm:$0xff]  ;;  %v1126_v30 = vpack.c.bf16 %v563_v23, %v562_v22  ;;  %v449_v33 = vld [vmem:[#allocation5 + $0xc8] sm:$0xff] }
  0x3d   :  { %1117 = vmatpush3.bf16.msra.mxu1 %v1116_v2  ;;  %1087 = vmatprep.subr.bf16.mxu0 %v1086_v3  ;;  %v546_v29 = vld [vmem:[#allocation5 + $0x130] sm:$0xff]  ;;  %v547_v31 = vld [vmem:[#allocation5 + $0x138] sm:$0xff]  ;;  %v564_v34 = vld [vmem:[#allocation5 + $0x1c0] sm:$0xff]  ;;  %v1096_v36 = vpack.c.bf16 %v431_v28, %v430_v27  ;;  %v1098_v38 = vpack.c.bf16 %v449_v33, %v448_v32  ;;  %v1308_v27 = vmov 1   ;;  %v1309_v28 = vmov 3  }
  0x3e   :  { %1119 = vmatprep.subr.bf16.mxu1 %v1118_v7  ;;  %v565_v35 = vld [vmem:[#allocation5 + $0x1c8] sm:$0xff]  ;;  %v1128_v37 = vpack.c.bf16 %v547_v31, %v546_v29  ;;  %v432_v39 = vld [vmem:[#allocation5 + $0x40] sm:$0xff]  ;;  %v450_v44 = vld [vmem:[#allocation5 + $0xd0] sm:$0xff]  ;;  %v87_v29 = vlaneseq }
  0x3f   :  { %v433_v40 = vld [vmem:[#allocation5 + $0x48] sm:$0xff]  ;;  %v548_v41 = vld [vmem:[#allocation5 + $0x140] sm:$0xff]  ;;  %v1130_v42 = vpack.c.bf16 %v565_v35, %v564_v34  ;;  %v451_v45 = vld [vmem:[#allocation5 + $0xd8] sm:$0xff] }
  0x40   :  { %1089 = vmatpush3.bf16.msra.mxu0 %v1088_v12  ;;  %v549_v43 = vld [vmem:[#allocation5 + $0x148] sm:$0xff]  ;;  %v566_v46 = vld [vmem:[#allocation5 + $0x1d0] sm:$0xff]  ;;  %v567_v47 = vld [vmem:[#allocation5 + $0x1d8] sm:$0xff]  ;;  %v1100_v48 = vpack.c.bf16 %v433_v40, %v432_v39  ;;  %v1102_v50 = vpack.c.bf16 %v451_v45, %v450_v44 }
  0x41   :  { %1121 = vmatpush3.bf16.msra.mxu1 %v1120_v13  ;;  %1091 = vmatprep.subr.bf16.mxu0 %v1090_v14  ;;  %v1132_v49 = vpack.c.bf16 %v549_v43, %v548_v41  ;;  %v434_v51 = vld [vmem:[#allocation5 + $0x50] sm:$0xff]  ;;  %v435_v52 = vld [vmem:[#allocation5 + $0x58] sm:$0xff]  ;;  %v1134_v54 = vpack.c.bf16 %v567_v47, %v566_v46  ;;  %v452_v56 = vld [vmem:[#allocation5 + $0xe0] sm:$0xff] }
  0x42   :  { %1123 = vmatprep.subr.bf16.mxu1 %v1122_v18  ;;  %v550_v53 = vld [vmem:[#allocation5 + $0x150] sm:$0xff]  ;;  %v551_v55 = vld [vmem:[#allocation5 + $0x158] sm:$0xff]  ;;  %v453_v57 = vld [vmem:[#allocation5 + $0xe8] sm:$0xff]  ;;  %v1104_v60 = vpack.c.bf16 %v435_v52, %v434_v51 }
  0x43   :  { %v568_v58 = vld [vmem:[#allocation5 + $0x1e0] sm:$0xff]  ;;  %v569_v59 = vld [vmem:[#allocation5 + $0x1e8] sm:$0xff]  ;;  %v1136_v61 = vpack.c.bf16 %v551_v55, %v550_v53  ;;  %v1106_v62 = vpack.c.bf16 %v453_v57, %v452_v56  ;;  %v454_v7 = vld [vmem:[#allocation5 + $0xf0] sm:$0xff] }
  0x44   :  { %1093 = vmatpush3.bf16.msra.mxu0 %v1092_v24  ;;  %v436_v63 = vld [vmem:[#allocation5 + $0x60] sm:$0xff]  ;;  %v437_v1 = vld [vmem:[#allocation5 + $0x68] sm:$0xff]  ;;  %v1138_v2 = vpack.c.bf16 %v569_v59, %v568_v58  ;;  %v455_v8 = vld [vmem:[#allocation5 + $0xf8] sm:$0xff] }
  0x45   :  { %1125 = vmatpush3.bf16.msra.mxu1 %v1124_v25  ;;  %1095 = vmatprep.subr.bf16.mxu0 %v1094_v26  ;;  %v1108_v3 = vpack.c.bf16 %v437_v1, %v436_v63  ;;  %v552_v4 = vld [vmem:[#allocation5 + $0x160] sm:$0xff]  ;;  %v553_v5 = vld [vmem:[#allocation5 + $0x168] sm:$0xff]  ;;  %v1110_v9 = vpack.c.bf16 %v455_v8, %v454_v7  ;;  %v438_v10 = vld [vmem:[#allocation5 + $0x70] sm:$0xff]  ;;  %v1306_v25 = vmov 0   ;;  %v1307_v26 = vmov 2  }
  0x46   :  { %1127 = vmatprep.subr.bf16.mxu1 %v1126_v30  ;;  %v1140_v6 = vpack.c.bf16 %v553_v5, %v552_v4  ;;  %v439_v0 = vld [vmem:[#allocation5 + $0x78] sm:$0xff]  ;;  %v570_v11 = vld [vmem:[#allocation5 + $0x1f0] sm:$0xff]  ;;  %v671_v18 = vld [vmem:[#allocation5 + $0x280] sm:$0xff]  ;;  %1222 = vset.pattern.permute.xlu0 %v1306_v25  ;;  %v1390_v30 = vshrl.u32 %v87_v29, 7 }
  0x47   :  { %v1112_v12 = vpack.c.bf16 %v439_v0, %v438_v10  ;;  %v571_v13 = vld [vmem:[#allocation5 + $0x1f8] sm:$0xff]  ;;  %v554_v14 = vld [vmem:[#allocation5 + $0x170] sm:$0xff]  ;;  %v672_v19 = vld [vmem:[#allocation5 + $0x288] sm:$0xff]  ;;  %1224 = vset.pattern.permute.xlu1 %v1307_v26 }
  0x48   :  { %1097 = vmatpush3.bf16.msra.mxu0 %v1096_v36  ;;  %v555_v15 = vld [vmem:[#allocation5 + $0x178] sm:$0xff]  ;;  %v1142_v16 = vpack.c.bf16 %v571_v13, %v570_v11  ;;  %v1146_v20 = vpack.c.bf16 %v672_v19, %v671_v18  ;;  %v786_v21 = vld [vmem:[#allocation5 + $0x380] sm:$0xff]  ;;  %v787_v22 = vld [vmem:[#allocation5 + $0x388] sm:$0xff]  ;;  %v89_v31 = vsub.s32 0, %v1390_v30  ;;  %v93_v33 = vsub.s32 1, %v1390_v30 }
  0x49   :  { %1129 = vmatpush3.bf16.msra.mxu1 %v1128_v37  ;;  %1099 = vmatprep.subr.bf16.mxu0 %v1098_v38  ;;  %v1144_v17 = vpack.c.bf16 %v555_v15, %v554_v14  ;;  %v1178_v23 = vpack.c.bf16 %v787_v22, %v786_v21  ;;  %v423_v24 = vld [vmem:[%s1444_s1] sm:$0xff]  ;;  %v97_v34 = vsub.s32 2, %v1390_v30  ;;  %v101_v35 = vsub.s32 3, %v1390_v30  ;;  %v656_v45 = vld [vmem:[#allocation5 + $0x208] sm:$0xff]  ;;  %v673_v51 = vld [vmem:[#allocation5 + $0x290] sm:$0xff] }
  0x4a   :  { %1131 = vmatprep.subr.bf16.mxu1 %v1130_v42  ;;  %528 = vperm.xlu0 %1222, %v423_v24   ;;  %v1396_v32 = vld [vmem:[%s1446_s3] sm:$0xff]  ;;  %v674_v52 = vld [vmem:[#allocation5 + $0x298] sm:$0xff]  ;;  %v109_v53 = vsub.s32 5, %v1390_v30  ;;  %v788_v55 = vld [vmem:[#allocation5 + $0x390] sm:$0xff]  ;;  %v117_v57 = vsub.s32 7, %v1390_v30 }
  0x4b   :  { %758 = vperm.xlu1 %1224, %v423_v24   ;;  %v90_v36 = vrot.slane %v1396_v32, %v89_v31  ;;  %v94_v37 = vrot.slane %v1396_v32, %v93_v33  ;;  %v98_v38 = vrot.slane %v1396_v32, %v97_v34  ;;  %v102_v39 = vrot.slane %v1396_v32, %v101_v35  ;;  %v655_v44 = vld [vmem:[#allocation5 + $0x200] sm:$0xff]  ;;  %v789_v56 = vld [vmem:[#allocation5 + $0x398] sm:$0xff]  ;;  %v772_v4 = vld [vmem:[#allocation5 + $0x310] sm:$0xff] }
  0x4c   :  { %1101 = vmatpush3.bf16.msra.mxu0 %v1100_v48  ;;  %v770_v46 = vld [vmem:[#allocation5 + $0x300] sm:$0xff]  ;;  %v1150_v1 = vpack.c.bf16 %v674_v52, %v673_v51  ;;  %v1182_v5 = vpack.c.bf16 %v789_v56, %v788_v55  ;;  %v676_v8 = vld [vmem:[#allocation5 + $0x2a8] sm:$0xff]  ;;  %v118_v11 = vrot.slane %v1396_v32, %v117_v57  ;;  %v682_v55 = vld [vmem:[#allocation5 + $0x2d8] sm:$0xff] }
  0x4d   :  { %1133 = vmatpush3.bf16.msra.mxu1 %v1132_v49  ;;  %1103 = vmatprep.subr.bf16.mxu0 %v1102_v50  ;;  %v771_v50 = vld [vmem:[#allocation5 + $0x308] sm:$0xff]  ;;  %v675_v7 = vld [vmem:[#allocation5 + $0x2a0] sm:$0xff]  ;;  %v796_v56 = vld [vmem:[#allocation5 + $0x3d0] sm:$0xff] }
  0x4e   :  { %1135 = vmatprep.subr.bf16.mxu1 %v1134_v54  ;;  %1223 = vset.pattern.permute.xlu0 %v1308_v27  ;;  %v1180_v63 = vpack.c.bf16 %v771_v50, %v770_v46  ;;  %v790_v10 = vld [vmem:[#allocation5 + $0x3a0] sm:$0xff]  ;;  %v791_v0 = vld [vmem:[#allocation5 + $0x3a8] sm:$0xff]  ;;  %v1154_v15 = vpack.c.bf16 %v676_v8, %v675_v7  ;;  %v792_v27 = vld [vmem:[#allocation5 + $0x3b0] sm:$0xff]  ;;  %v113_v8 = vsub.s32 6, %v1390_v30 }
  0x4f   :  { %1225 = vset.pattern.permute.xlu1 %v1309_v28  ;;  %643 = vperm.xlu0 %1223, %v423_v24   ;;  %v774_v18 = vld [vmem:[#allocation5 + $0x320] sm:$0xff]  ;;  %v1186_v21 = vpack.c.bf16 %v791_v0, %v790_v10  ;;  %v775_v22 = vld [vmem:[#allocation5 + $0x328] sm:$0xff]  ;;  %v797_v57 = vld [vmem:[#allocation5 + $0x3d8] sm:$0xff]  ;;  %v105_v10 = vsub.s32 4, %v1390_v30 }
  0x50   :  { %1105 = vmatpush3.bf16.msra.mxu0 %v1104_v60  ;;  %873 = vperm.xlu1 %1225, %v423_v24   ;;  %v1148_v60 = vpack.c.bf16 %v656_v45, %v655_v44  ;;  %v678_v24 = vld [vmem:[#allocation5 + $0x2b8] sm:$0xff]  ;;  %v1188_v34 = vpack.c.bf16 %v775_v22, %v774_v18  ;;  %v794_v44 = vld [vmem:[#allocation5 + $0x3c0] sm:$0xff]  ;;  %v795_v45 = vld [vmem:[#allocation5 + $0x3c8] sm:$0xff] }
  0x51   :  { %1137 = vmatpush3.bf16.msra.mxu1 %v1136_v61  ;;  %1107 = vmatprep.subr.bf16.mxu0 %v1106_v62  ;;  %v664_v50 = vld [vmem:[#allocation5 + $0x248] sm:$0xff]  ;;  %v778_v51 = vld [vmem:[#allocation5 + $0x340] sm:$0xff]  ;;  %v1194_v52 = vpack.c.bf16 %v795_v45, %v794_v44  ;;  %v686_v18 = vld [vmem:[#allocation5 + $0x2f8] sm:$0xff] }
  0x52   :  { %1139 = vmatprep.subr.bf16.mxu1 %v1138_v2  ;;  %v657_v2 = vld [vmem:[#allocation5 + $0x210] sm:$0xff] }
  0x53   :  { %1226 = vset.pattern.permute.xlu0 %v1309_v28  ;;  %v793_v28 = vld [vmem:[#allocation5 + $0x3b8] sm:$0xff] }
  0x54   :  { %1109 = vmatpush3.bf16.msra.mxu0 %v1108_v3  ;;  %v658_v3 = vld [vmem:[#allocation5 + $0x218] sm:$0xff] }
  0x55   :  { %1141 = vmatpush3.bf16.msra.mxu1 %v1140_v6  ;;  %1111 = vmatprep.subr.bf16.mxu0 %v1110_v9  ;;  %v773_v6 = vld [vmem:[#allocation5 + $0x318] sm:$0xff]  ;;  %v110_v9 = vrot.slane %v1396_v32, %v109_v53  ;;  %v779_v53 = vld [vmem:[#allocation5 + $0x348] sm:$0xff] }
  0x56   :  { %1143 = vmatprep.subr.bf16.mxu1 %v1142_v16  ;;  %v1184_v14 = vpack.c.bf16 %v773_v6, %v772_v4  ;;  %v659_v16 = vld [vmem:[#allocation5 + $0x220] sm:$0xff]  ;;  %v684_v4 = vld [vmem:[#allocation5 + $0x2e8] sm:$0xff] }
  0x57   :  { %v799_v6 = vld [vmem:[#allocation5 + $0x3e8] sm:$0xff] }
  0x58   :  { %1113 = vmatpush3.bf16.msra.mxu0 %v1112_v12  ;;  %v1152_v12 = vpack.c.bf16 %v658_v3, %v657_v2  ;;  %v781_v2 = vld [vmem:[#allocation5 + $0x358] sm:$0xff]  ;;  %v683_v3 = vld [vmem:[#allocation5 + $0x2e0] sm:$0xff] }
  0x59   :  { %1145 = vmatpush3.bf16.msra.mxu1 %v1144_v17  ;;  %1147 = vmatprep.subr.bf16.mxu0 %v1146_v20  ;;  %v660_v17 = vld [vmem:[#allocation5 + $0x228] sm:$0xff]  ;;  %v1170_v0 = vpack.c.bf16 %v684_v4, %v683_v3 }
  0x5a   :  { %1179 = vmatprep.subr.bf16.mxu1 %v1178_v23  ;;  %v677_v23 = vld [vmem:[#allocation5 + $0x2b0] sm:$0xff]  ;;  %v1156_v31 = vpack.c.bf16 %v660_v17, %v659_v16  ;;  %v783_v16 = vld [vmem:[#allocation5 + $0x368] sm:$0xff] }
  0x5b   :  { %v1158_v35 = vpack.c.bf16 %v678_v24, %v677_v23  ;;  %v685_v17 = vld [vmem:[#allocation5 + $0x2f0] sm:$0xff]  ;;  %v114_v23 = vrot.slane %v1396_v32, %v113_v8  ;;  %v106_v24 = vrot.slane %v1396_v32, %v105_v10 }
 0x106   :  { %v197_v40 = vpop.f32.mrb[0].mxu0 }
 0x107   :  { %v198_v41 = vadd.f32 %v197_v40, %v90_v36  ;;  %v199_v42 = vpop.f32.mrb[1].mxu0  ;;  %v268_v43 = vpop.f32.mrb[0].mxu1  ;;  %v661_v36 = vld [vmem:[#allocation5 + $0x230] sm:$0xff]  ;;  %v1190_v40 = vpack.c.bf16 %v793_v28, %v792_v27  ;;  %v670_v27 = vld [vmem:[#allocation5 + $0x278] sm:$0xff] }
 0x108   :  { %v200_v47 = vadd.f32 %v199_v42, %v94_v37  ;;  %v269_v48 = vadd.f32 %v268_v43, %v98_v38  ;;  %v270_v49 = vpop.f32.mrb[1].mxu1  ;;  %v662_v37 = vld [vmem:[#allocation5 + $0x238] sm:$0xff]  ;;  %v776_v38 = vld [vmem:[#allocation5 + $0x330] sm:$0xff]  ;;  %v679_v42 = vld [vmem:[#allocation5 + $0x2c0] sm:$0xff] }
 0x109   :  { %v271_v54 = vadd.f32 %v270_v49, %v102_v39  ;;  %v415_v61 = vmax.f32 %v198_v41, 0.0  ;;  %v777_v41 = vld [vmem:[#allocation5 + $0x338] sm:$0xff]  ;;  %v680_v43 = vld [vmem:[#allocation5 + $0x2c8] sm:$0xff]  ;;  %v1160_v46 = vpack.c.bf16 %v662_v37, %v661_v36  ;;  %v663_v49 = vld [vmem:[#allocation5 + $0x240] sm:$0xff] }
 0x10a   :  { %v416_v58 = vmax.f32 %v200_v47, 0.0  ;;  %v417_v59 = vmax.f32 %v269_v48, 0.0  ;;  %v1192_v47 = vpack.c.bf16 %v777_v41, %v776_v38  ;;  %v1162_v48 = vpack.c.bf16 %v680_v43, %v679_v42  ;;  %v529_v38 = vpop.permute.xlu0 %528 }
 0x10b   :  { %v418_v62 = vmax.f32 %v271_v54, 0.0  ;;  %v681_v54 = vld [vmem:[#allocation5 + $0x2d0] sm:$0xff] }
 0x10c   :  { %520 = vmatprep.mubr.f32.mxu0 %v416_v58  ;;  %v1164_v58 = vpack.c.bf16 %v664_v50, %v663_v49  ;;  %v907_v50 = vld [vmem:[%s1448_s5 + $0x1] ss:$0 sm:$0xff] }
 0x10d   :  { %521 = vmatmul.mubr.f32.vlgmr.msra.gmra.mrb[4].mxu0 %v415_v61  ;;  %636 = vmatprep.mubr.f32.mxu1 %v418_v62  ;;  %v665_v61 = vld [vmem:[#allocation5 + $0x250] sm:$0xff]  ;;  %v666_v62 = vld [vmem:[#allocation5 + $0x258] sm:$0xff] }
 0x10e   :  { %1149 = vmatpush3.bf16.msra.mxu0 %v1148_v60  ;;  %637 = vmatmul.mubr.f32.vlgmr.msra.gmra.mrb[4].mxu1 %v417_v59  ;;  %v1409_v13 = vpop.f32.mrb[2].mxu0  ;;  %v1196_v59 = vpack.c.bf16 %v779_v53, %v778_v51  ;;  %v1166_v60 = vpack.c.bf16 %v682_v55, %v681_v54  ;;  %v1168_v7 = vpack.c.bf16 %v666_v62, %v665_v61  ;;  %v644_v44 = vpop.permute.xlu0 %643 }
 0x10f   :  { %1181 = vmatpush3.bf16.msra.mxu1 %v1180_v63  ;;  %1151 = vmatprep.subr.bf16.mxu0 %v1150_v1  ;;  %v341_v19 = vpop.f32.mrb[3].mxu0  ;;  %v1411_v20 = vpop.f32.mrb[2].mxu1  ;;  %v780_v63 = vld [vmem:[#allocation5 + $0x350] sm:$0xff]  ;;  %v1198_v1 = vpack.c.bf16 %v797_v57, %v796_v56 }
 0x110   :  { %1183 = vmatprep.subr.bf16.mxu1 %v1182_v5  ;;  %v342_v25 = vadd.f32 %v341_v19, %v110_v9  ;;  %v412_v26 = vpop.f32.mrb[3].mxu1  ;;  %v798_v5 = vld [vmem:[#allocation5 + $0x3e0] sm:$0xff]  ;;  %v1200_v9 = vpack.c.bf16 %v781_v2, %v780_v63  ;;  %v800_v19 = vld [vmem:[#allocation5 + $0x3f0] sm:$0xff]  ;;  %v759_v51 = vpop.permute.xlu1 %758 }
 0x111   :  { %v413_v29 = vadd.f32 %v412_v26, %v118_v11  ;;  %v667_v11 = vld [vmem:[#allocation5 + $0x260] sm:$0xff]  ;;  %v669_v26 = vld [vmem:[#allocation5 + $0x270] sm:$0xff] }
 0x112   :  { %1153 = vmatpush3.bf16.msra.mxu0 %v1152_v12  ;;  %v420_v33 = vmax.f32 %v342_v25, 0.0  ;;  %v668_v12 = vld [vmem:[#allocation5 + $0x268] sm:$0xff]  ;;  %v1174_v25 = vpack.c.bf16 %v686_v18, %v685_v17  ;;  %v909_v2 = vld [vmem:[%s1448_s5 + $0x3] ss:$0 sm:$0xff] }
 0x113   :  { %1185 = vmatpush3.bf16.msra.mxu1 %v1184_v14  ;;  %1155 = vmatprep.subr.bf16.mxu0 %v1154_v15  ;;  %v422_v39 = vmax.f32 %v413_v29, 0.0  ;;  %v782_v14 = vld [vmem:[#allocation5 + $0x360] sm:$0xff]  ;;  %v1202_v15 = vpack.c.bf16 %v799_v6, %v798_v5  ;;  %v1172_v22 = vpack.c.bf16 %v668_v12, %v667_v11  ;;  %v784_v29 = vld [vmem:[#allocation5 + $0x370] sm:$0xff] }
 0x114   :  { %1187 = vmatprep.subr.bf16.mxu1 %v1186_v21  ;;  %751 = vmatprep.mubr.f32.mxu0 %v420_v33  ;;  %v801_v21 = vld [vmem:[#allocation5 + $0x3f8] sm:$0xff]  ;;  %v1204_v30 = vpack.c.bf16 %v783_v16, %v782_v14  ;;  %v411_v33 = vadd.f32 %v1411_v20, %v114_v23  ;;  %v874_v62 = vpop.permute.xlu1 %873 }
 0x115   :  { %866 = vmatprep.mubr.f32.mxu1 %v422_v39  ;;  %v1206_v28 = vpack.c.bf16 %v801_v21, %v800_v19  ;;  %v906_v39 = vld [vmem:[%s1448_s5] ss:$0 sm:$0xff]  ;;  %v883_v6 = vmul.f32 %v909_v2, %v874_v62 }
 0x116   :  { %1157 = vmatpush3.bf16.msra.mxu0 %v1156_v31  ;;  %v785_v31 = vld [vmem:[#allocation5 + $0x378] sm:$0xff]  ;;  %v421_v32 = vmax.f32 %v411_v33, 0.0  ;;  %v538_v42 = vmul.f32 %v906_v39, %v529_v38 }
 0x117   :  { %1189 = vmatpush3.bf16.msra.mxu1 %v1188_v34  ;;  %1159 = vmatprep.subr.bf16.mxu0 %v1158_v35  ;;  %v1176_v34 = vpack.c.bf16 %v670_v27, %v669_v26  ;;  %v340_v35 = vadd.f32 %v1409_v13, %v106_v24  ;;  %v1208_v36 = vpack.c.bf16 %v785_v31, %v784_v29 }
 0x118   :  { %1191 = vmatprep.subr.bf16.mxu1 %v1190_v40 }
 0x119   :  { %v419_v37 = vmax.f32 %v340_v35, 0.0 }
 0x11a   :  { %1161 = vmatpush3.bf16.msra.mxu0 %v1160_v46 }
 0x11b   :  { %1193 = vmatpush3.bf16.msra.mxu1 %v1192_v47  ;;  %1163 = vmatprep.subr.bf16.mxu0 %v1162_v48 }
 0x11c   :  { %1195 = vmatprep.subr.bf16.mxu1 %v1194_v52  ;;  %v653_v52 = vmul.f32 %v907_v50, %v644_v44 }
 0x11e   :  { %1165 = vmatpush3.bf16.msra.mxu0 %v1164_v58  ;;  %v908_v58 = vld [vmem:[%s1448_s5 + $0x2] ss:$0 sm:$0xff] }
 0x11f   :  { %1197 = vmatpush3.bf16.msra.mxu1 %v1196_v59  ;;  %1167 = vmatprep.subr.bf16.mxu0 %v1166_v60  ;;  %v768_v63 = vmul.f32 %v908_v58, %v759_v51 }
 0x120   :  { %1199 = vmatprep.subr.bf16.mxu1 %v1198_v1 }
 0x122   :  { %1169 = vmatpush3.bf16.msra.mxu0 %v1168_v7 }
 0x123   :  { %1201 = vmatpush3.bf16.msra.mxu1 %v1200_v9  ;;  %1171 = vmatprep.subr.bf16.mxu0 %v1170_v0 }
 0x124   :  { %1203 = vmatprep.subr.bf16.mxu1 %v1202_v15 }
 0x126   :  { %1173 = vmatpush3.bf16.msra.mxu0 %v1172_v22 }
 0x127   :  { %1205 = vmatpush3.bf16.msra.mxu1 %v1204_v30  ;;  %1175 = vmatprep.subr.bf16.mxu0 %v1174_v25 }
 0x128   :  { %1207 = vmatprep.subr.bf16.mxu1 %v1206_v28 }
 0x12a   :  { %1177 = vmatpush3.bf16.msra.mxu0 %v1176_v34 }
 0x12b   :  { %1209 = vmatpush3.bf16.msra.mxu1 %v1208_v36 }
 0x12d   :  { %752 = vmatmul.mubr.f32.vlgmr.msra.gmra.mrb[6].mxu0 %v419_v37 }
 0x12e   :  { %867 = vmatmul.mubr.f32.vlgmr.msra.gmra.mrb[6].mxu1 %v421_v32 }
 0x1e0   :  { %v942_v40 = vpop.f32.mrb[4].mxu0 }
 0x1e1   :  { %v943_v20 = vpop.f32.mrb[5].mxu0  ;;  %v977_v41 = vpop.f32.mrb[4].mxu1 }
 0x1e2   :  { %v944_v13 = vadd.f32 %v943_v20, %v942_v40  ;;  %v978_v43 = vpop.f32.mrb[5].mxu1 }
 0x1e3   :  { %v979_v45 = vadd.f32 %v978_v43, %v977_v41 }
 0x1e4   :  { %v531_v46 = vmul.f32 %v944_v13, %v529_v38 }
 0x1e5   :  { %v646_v47 = vmul.f32 %v979_v45, %v644_v44 }
 0x1e6   :  { %v539_v48 = vadd.f32 %v538_v42, %v531_v46 }
 0x1e8   :  { %v647_v49 = vadd.f32 %v646_v47, %v539_v48 }
 0x1ea   :  { %v654_v60 = vadd.f32 %v653_v52, %v647_v49 }
 0x200   :  { %v1012_v53 = vpop.f32.mrb[6].mxu0 }
 0x201   :  { %v1013_v54 = vpop.f32.mrb[7].mxu0  ;;  %v1047_v55 = vpop.f32.mrb[6].mxu1 }
 0x202   :  { %v1014_v56 = vadd.f32 %v1013_v54, %v1012_v53  ;;  %v1048_v57 = vpop.f32.mrb[7].mxu1 }
 0x203   :  { %v1049_v59 = vadd.f32 %v1048_v57, %v1047_v55 }
 0x204   :  { %v761_v61 = vmul.f32 %v1014_v56, %v759_v51 }
 0x205   :  { %v876_v4 = vmul.f32 %v1049_v59, %v874_v62 }
 0x206   :  { %v762_v1 = vadd.f32 %v761_v61, %v654_v60 }
 0x208   :  { %v769_v3 = vadd.f32 %v768_v63, %v762_v1 }
 0x20a   :  { %v877_v5 = vadd.f32 %v876_v4, %v769_v3 }
 0x20c   :  { %v884_v7 = vadd.f32 %v883_v6, %v877_v5 }
 0x20e   :  { %885 = vst [vmem:[#allocation7] sm:$0xff] %v884_v7 }
 0x20f   :  { %1282 = shalt.err (!%p1279_p6)
}
 0x210   :  { %s1283_s5 = scalar_lea.hbm %s1449_s6, 128 }
 0x211   :  { %p1284_p7 = scmp.ne.s32.totalorder %s1449_s6, %s1283_s5  ;;  %p1287_p8 = scmp.lt.u32.totalorder %s1283_s5, %s1449_s6 }
 0x213   :  { %p1289_p9 = pnand %p1287_p8, %p1284_p7 }
 0x215   :  { %1292 = shalt.err (!%p1289_p9)
}
 0x216   :  { %895 = dma.vmem_to_hbm [thread:$0]  %s893_s11, 128, %s1449_s6, [#allocation4]  }
 0x217   :  { %1297 = dma.done.wait [#allocation4], 128  }
 0x218   :  { %1298 = vsyncadd [#allocation4], 4294967168 }
 0x219   :  { %899 = vsyncpa [#allocation3], 1 }
 0x21a   :  { %900 = vsyncpa [#allocation6], 1 }
 0x21b   :  { %901 = vsyncpa [#allocation4], 1 }

</bundles_post_ra>
